<compile_context>
chip_gen: v5e
topology: v5e:2x2
jax: 0.10.0
libtpu: 0.0.40
codegen_flags: <defaults>
</compile_context>

<pallas_src>
import functools

import jax
import jax.numpy as jnp
from jax.experimental import pallas as pl
from jax.experimental.pallas import tpu as pltpu


def _matcher_kernel(feat_ref, patch_ref, out_ref, energy_ref, *, c, pool):
    # feat_ref:   (c,   TM)  channels-major feature tile (hw lane-dense)
    # patch_ref:  (n,   c)   patch tokens for this batch element
    # out_ref:    (c+1, TM)  fused output: rows [0:c] = features, row c = corr
    # energy_ref: (n,   TM)  energy^T tile (hw lane-dense -> unmasked vst)
    f = feat_ref[...]
    e = jnp.dot(patch_ref[...], f,
                preferred_element_type=jnp.float32)          # (n, TM) on MXU
    energy_ref[...] = e.astype(energy_ref.dtype)
    if pool == "mean":
        corr = jnp.mean(e, axis=0, keepdims=True)            # sublane reduce (XLU)
    else:
        corr = jnp.max(e, axis=0, keepdims=True)
    out_ref[0:c, :] = f.astype(out_ref.dtype)
    out_ref[c:c + 1, :] = corr.astype(out_ref.dtype)


def _pick_hw_tile(hw_p, c, n, bs, *, target=4096, vmem_budget_bytes=8 << 20):
    """Largest multiple of 128 dividing hw_p, bounded by a VMEM budget.

    Budget covers the double-buffered feat (c), fused out (c+1) and energy (n)
    blocks. When bs == 1, cap at hw_p/2 so both TensorCores (v7x) get work.
    """
    assert hw_p % 128 == 0
    bytes_per_col = (c + (c + 1) + n) * 4          # f32 per lane-column, all blocks
    cap = vmem_budget_bytes // (2 * bytes_per_col)  # double-buffered
    cap = min(cap, target, hw_p)
    cap -= cap % 128
    cap = max(cap, 128)
    if bs < 2 and hw_p >= 256:
        # guarantee >=2 grid programs on a parallel axis for megacore sharding
        cap = min(cap, max(128, (hw_p // 2) // 128 * 128))
    tm = cap
    while hw_p % tm != 0:                           # terminates at 128
        tm -= 128
    return tm


def inner_product_matcher(features, patches_feat, pool="mean",
                          energy_dtype=jnp.float32, transpose_energy=True):
    if pool not in ("mean", "max"):
        raise ValueError(f"unsupported pool: {pool}")
    bs, c, h, w = features.shape
    n = patches_feat.shape[0]
    hw = h * w
    hw_p = ((hw + 127) // 128) * 128                          # lane-dense padding

    # Channels-major: features reshaped (free); patches (tiny) transposed.
    feat_cm = features.reshape(bs, c, hw)                     # (bs, c, hw)
    if hw_p != hw:
        feat_cm = jnp.pad(feat_cm, ((0, 0), (0, 0), (0, hw_p - hw)))
    patches = patches_feat.transpose(1, 0, 2)                 # (bs, n, c)

    tm = _pick_hw_tile(hw_p, c, n, bs)
    grid = (bs, hw_p // tm)

    kernel = functools.partial(_matcher_kernel, c=c, pool=pool)

    out_cm, energy_t = pl.pallas_call(
        kernel,
        grid=grid,
        in_specs=[
            pl.BlockSpec((pl.Squeezed(), c, tm), lambda b, i: (b, 0, i)),
            pl.BlockSpec((pl.Squeezed(), n, c), lambda b, i: (b, 0, 0)),
        ],
        out_specs=(
            pl.BlockSpec((pl.Squeezed(), c + 1, tm), lambda b, i: (b, 0, i)),
            pl.BlockSpec((pl.Squeezed(), n, tm), lambda b, i: (b, 0, i)),
        ),
        out_shape=(
            jax.ShapeDtypeStruct((bs, c + 1, hw_p), features.dtype),  # fused out
            jax.ShapeDtypeStruct((bs, n, hw_p), energy_dtype),        # energy^T
        ),
        compiler_params=pltpu.CompilerParams(
            dimension_semantics=("parallel", "parallel")),
    )(feat_cm, patches)

    if hw_p != hw:
        out_cm = out_cm[:, :, :hw]
        energy_t = energy_t[:, :, :hw]

    out = out_cm.reshape(bs, c + 1, h, w)
    if transpose_energy:
        # Reference layout (bs, hw, n). Pass transpose_energy=False to keep the
        # lane-dense energy^T and skip this extra HBM pass over the big tensor.
        energy = energy_t.transpose(0, 2, 1)
    else:
        energy = energy_t
    return out, energy


def _reference(features, patches_feat, pool="mean"):
    bs, c, h, w = features.shape
    proj = features.reshape(bs, c, h * w).transpose(0, 2, 1)
    pat = patches_feat.transpose(1, 2, 0)
    energy = jnp.einsum("bpc,bcn->bpn", proj, pat)
    if pool == "mean":
        corr = energy.mean(axis=-1, keepdims=True)
    else:
        corr = energy.max(axis=-1, keepdims=True)
    out = jnp.concatenate((proj, corr), axis=-1)
    return out.transpose(0, 2, 1).reshape(bs, c + 1, h, w), energy


if __name__ == "__main__":
    key = jax.random.PRNGKey(0)

    # (bs, c, h, w, n): main config + a non-128-divisible hw config (padding path)
    configs = [
        (2, 4, 16, 16, 8),   # hw = 256 (multiple of 128)
        (1, 4, 6, 10, 8),    # hw = 60  (padded to 128), bs = 1
    ]

    for bs, c, h, w, n in configs:
        key, k1, k2 = jax.random.split(key, 3)
        features = jax.random.normal(k1, (bs, c, h, w), dtype=jnp.float32)
        patches_feat = jax.random.normal(k2, (n, bs, c), dtype=jnp.float32)

        for pool in ("mean", "max"):
            out, energy = inner_product_matcher(features, patches_feat, pool=pool)
            out = jax.block_until_ready(out)
            energy = jax.block_until_ready(energy)

            ref_out, ref_energy = _reference(features, patches_feat, pool=pool)
            assert out.shape == (bs, c + 1, h, w), (pool, out.shape)
            assert energy.shape == (bs, h * w, n), (pool, energy.shape)
            assert jnp.allclose(out, ref_out, atol=1e-5, rtol=1e-5), pool
            assert jnp.allclose(energy, ref_energy, atol=1e-5, rtol=1e-5), pool

    print("KERNEL_OK")
</pallas_src>

<mosaic_0001>
module attributes {stable_mosaic.version = 11 : i64} {
  func.func @_matcher_kernel(%arg0: i32, %arg1: i32, %arg2: memref<1x4x256xf32, #tpu.memory_space<vmem>>, %arg3: memref<1x8x4xf32, #tpu.memory_space<vmem>>, %arg4: memref<1x5x256xf32, #tpu.memory_space<vmem>>, %arg5: memref<1x8x256xf32, #tpu.memory_space<vmem>>) attributes {dimension_semantics = [#tpu.dimension_semantics<parallel>, #tpu.dimension_semantics<parallel>], iteration_bounds = array<i64: 2, 1>, scalar_prefetch = 0 : i64, scratch_operands = 0 : i64, tpu.core_type = #tpu.core_type<tc>, window_params = [{transform_indices = @transform_0, window_bounds = array<i64: 1, 4, 256>}, {transform_indices = @transform_1, window_bounds = array<i64: 1, 8, 4>}, {transform_indices = @transform_2, window_bounds = array<i64: 1, 5, 256>}, {transform_indices = @transform_3, window_bounds = array<i64: 1, 8, 256>}]} {
    %c0 = arith.constant 0 : index
    %c0_0 = arith.constant 0 : index
    %c0_1 = arith.constant 0 : index
    %0 = vector.load %arg2[%c0, %c0_0, %c0_1] : memref<1x4x256xf32, #tpu.memory_space<vmem>>, vector<1x4x256xf32>
    %1 = vector.shape_cast %0 : vector<1x4x256xf32> to vector<4x256xf32>
    %c0_2 = arith.constant 0 : index
    %c0_3 = arith.constant 0 : index
    %c0_4 = arith.constant 0 : index
    %2 = vector.load %arg3[%c0_2, %c0_3, %c0_4] : memref<1x8x4xf32, #tpu.memory_space<vmem>>, vector<1x8x4xf32>
    %3 = vector.shape_cast %2 : vector<1x8x4xf32> to vector<8x4xf32>
    %cst = arith.constant dense<0.000000e+00> : vector<8x256xf32>
    %4 = tpu.matmul %3, %1, %cst {dimension_numbers = #tpu.dot_dimension_numbers<[1], [0], [0], [1], [0, 0, 1, 1], [], []>} : vector<8x4xf32>, vector<4x256xf32>, vector<8x256xf32> -> vector<8x256xf32>
    %c0_5 = arith.constant 0 : index
    %c0_6 = arith.constant 0 : index
    %c0_7 = arith.constant 0 : index
    %5 = vector.load %arg5[%c0_5, %c0_6, %c0_7] : memref<1x8x256xf32, #tpu.memory_space<vmem>>, vector<1x8x256xf32>
    %6 = vector.shape_cast %5 : vector<1x8x256xf32> to vector<8x256xf32>
    %7 = vector.shape_cast %4 : vector<8x256xf32> to vector<1x8x256xf32>
    tpu.vector_store %arg5[%c0_5, %c0_6, %c0_7], %7 {strides = array<i32>} : memref<1x8x256xf32, #tpu.memory_space<vmem>>, vector<1x8x256xf32>,
    %cst_8 = arith.constant dense<0.000000e+00> : vector<256xf32>
    %8 = vector.multi_reduction <add>, %4, %cst_8 [0] : vector<8x256xf32> to vector<256xf32>
    %9 = vector.shape_cast %8 : vector<256xf32> to vector<1x256xf32>
    %cst_9 = arith.constant 8.000000e+00 : f32
    %10 = vector.broadcast %cst_9 : f32 to vector<1x256xf32>
    %11 = arith.divf %9, %10 : vector<1x256xf32>
    %c0_10 = arith.constant 0 : index
    %c0_11 = arith.constant 0 : index
    %c0_12 = arith.constant 0 : index
    %12 = vector.load %arg4[%c0_10, %c0_11, %c0_12] : memref<1x5x256xf32, #tpu.memory_space<vmem>>, vector<1x4x256xf32>
    %13 = vector.shape_cast %12 : vector<1x4x256xf32> to vector<4x256xf32>
    %14 = vector.shape_cast %1 : vector<4x256xf32> to vector<1x4x256xf32>
    tpu.vector_store %arg4[%c0_10, %c0_11, %c0_12], %14 {strides = array<i32>} : memref<1x5x256xf32, #tpu.memory_space<vmem>>, vector<1x4x256xf32>,
    %c0_13 = arith.constant 0 : index
    %c4 = arith.constant 4 : index
    %c0_14 = arith.constant 0 : index
    %15 = vector.load %arg4[%c0_13, %c4, %c0_14] : memref<1x5x256xf32, #tpu.memory_space<vmem>>, vector<1x1x256xf32>
    %16 = vector.shape_cast %15 : vector<1x1x256xf32> to vector<1x256xf32>
    %17 = vector.shape_cast %11 : vector<1x256xf32> to vector<1x1x256xf32>
    tpu.vector_store %arg4[%c0_13, %c4, %c0_14], %17 {strides = array<i32>} : memref<1x5x256xf32, #tpu.memory_space<vmem>>, vector<1x1x256xf32>,
    return
  }
  func.func @transform_0(%arg0: i32, %arg1: i32) -> (i32, i32, i32) {
    %c0_i32 = arith.constant 0 : i32
    %c0_i32_0 = arith.constant 0 : i32
    return %arg0, %c0_i32, %arg1 : i32, i32, i32
  }
  func.func @transform_1(%arg0: i32, %arg1: i32) -> (i32, i32, i32) {
    %c0_i32 = arith.constant 0 : i32
    %c0_i32_0 = arith.constant 0 : i32
    %c0_i32_1 = arith.constant 0 : i32
    return %arg0, %c0_i32, %c0_i32_0 : i32, i32, i32
  }
  func.func @transform_2(%arg0: i32, %arg1: i32) -> (i32, i32, i32) {
    %c0_i32 = arith.constant 0 : i32
    %c0_i32_0 = arith.constant 0 : i32
    return %arg0, %c0_i32, %arg1 : i32, i32, i32
  }
  func.func @transform_3(%arg0: i32, %arg1: i32) -> (i32, i32, i32) {
    %c0_i32 = arith.constant 0 : i32
    %c0_i32_0 = arith.constant 0 : i32
    return %arg0, %c0_i32, %arg1 : i32, i32, i32
  }
}

</mosaic_0001>

<bundles_post_ra>
// kernel: tpu_custom_call.1
= control target key start
LH: loop header
LB: loop body
LE: loop exit
PB: predicated region body
PF: predicated region fallthrough
CT: control target
= control target key end

     0   :  { %9 = vsyncpa [#allocation3], 0  ;;  %s787_s0 = inlined_call_operand.vmem [shape: f32[2,4,256], index: 0, kind: input, shape index: {}]   ;;  %s788_s1 = inlined_call_operand.vmem [shape: f32[2,8,4], index: 1, kind: input, shape index: {}]   ;;  %s789_s2 = inlined_call_operand.vmem [shape: f32[2,5,256], index: 2, kind: output, shape index: {0}]   ;;  %s790_s3 = inlined_call_operand.hbm [shape: f32[2,8,256], index: 3, kind: output, shape index: {1}]  }
   0x1   :  { %11 = vsyncpa [#allocation3 + $0x1], 0  ;;  %s679_s12 = smov 0   ;;  %s681_s13 = smov 0  }
   0x2   :  { %s683_s14 = smov 0   ;;  %s685_s15 = smov 0  }
   0x3   :  { %s687_s16 = smov 0   ;;  %s689_s17 = smov 0  }
   0x4 LB: > { %s496_s18 = sadd.s32 4294967295, %s656_s17   ;;  %s497_s19 = sadd.s32 4294967294, %s656_s17   ;;  %s656_s17 = sphi %s689_s17, %s17_s17   ;;  %s652_s16 = sphi %s687_s16, %s797_s16   ;;  %s648_s15 = sphi %s685_s15, %s796_s15   ;;  %s644_s14 = sphi %s683_s14, %s795_s14   ;;  %s640_s13 = sphi %s681_s13, %s794_s13   ;;  %s636_s12 = sphi %s679_s12, %s793_s12  }
   0x5   : > { %s29_s20 = sadd.s32 1, %s652_s16  ;;  %s120_s21 = sadd.s32 1, %s644_s14 }
   0x6   : > { %p31_p0 = scmp.ge.s32.totalorder %s29_s20, 2  ;;  %p130_p1 = scmp.ne.s32.totalorder %s644_s14, %s640_s13 }
   0x7   : > { %p131_p2 = scmp.eq.s32.totalorder %s496_s18, 1  ;;  %p136_p3 = scmp.ne.s32.totalorder %s640_s13, %s636_s12 }
   0x8   : > { %s799_s20 = smov (%p31_p0, %s29_s20), 0  ;;  %p137_p5 = scmp.eq.s32.totalorder %s497_s19, 1 }
   0x9   : > { %p719_p4 = por %p131_p2, %p130_p1  ;;  %s115_s23 = ssub.s32 %s652_s16, %s799_s20 }
   0xa   : > { %p500_p6 = scmp.ge.s32.totalorder %s656_s17, 1  ;;  %p118_p7 = scmp.eq.s32.totalorder %s115_s23, 0 }
   0xb   : > { %p726_p8 = por %p137_p5, %p136_p3  ;;  %p175_p9 = scmp.lt.s32.totalorder %s656_s17, 3 }
   0xc   : > { %s732_s25 = scalar_select %p118_p7, %s644_s14, %s120_s21  }
   0xd   : > { %p176_p10 = pnand %p500_p6, %p175_p9 }
   0xe   : > { %p217_p11 = scmp.lt.s32.totalorder (!%p176_p10), %s648_s15, 1  ;;  %s213_s11 = sand.u32 (!%p176_p10), 1, %s640_s13  }
   0xf   : > { %179 = sbr.rel (%p176_p10) target bundleno = 178 (0xb2), region = 28  ;;  %s519_s18 = sshll.u32 (!%p176_p10), %s648_s15, 4 }
  0x10   : > { %s501_s19 = sshll.u32 (!%p176_p10), %s213_s11, 4 }
  0x14   : > { %s218_s26 = scalar_select %p217_p11, %s648_s15, 1  ;;  %vm251_vm0 = vcmask 1043456   ;;  %vm247_vm1 = vcmask 31744   ;;  %v658_v6 = vmov 8.0  }
  0x15   : > { %576 = vrcp.f32 %v658_v6  ;;  %s349_s15 = scalar_lea.sflag [#allocation3], %s213_s11 }
  0x16   : > { %s517_s27 = sshll.u32 %s218_s26, 3  ;;  %s518_s7 = sshll.u32 %s218_s26, 4 }
  0x17   : > { %s224_s30 = scalar_lea.vmem %s787_s0, %s517_s27  ;;  %s229_s6 = scalar_lea.vmem %s788_s1, %s517_s27 }
  0x18   : > { %v241_v0 = vld [vmem:[%s224_s30] sm:$0xff]  ;;  %s745_s10 = scalar_lea.vmem %s789_s2, %s518_s7  ;;  %s366_s26 = scalar_lea.hbm %s790_s3, %s519_s18 }
  0x19   : > { %244 = vst [vmem:[#allocation1] ss:$2 sm:$0xff] %v241_v0  ;;  %v242_v1 = vld [vmem:[%s229_s6] sm:$0xff]  ;;  %s215_s27 = scalar_lea.vmem [#allocation2], %s501_s19  ;;  %s370_s29 = sshll.u32 %s366_s26, 4  ;;  %s371_s29 = int_to_ptr.hbm [resolvable:$true] %s370_s29 }
  0x1a   : > { %s368_s28 = sshll.u32 %s215_s27, 4  ;;  %s592_s30 = sshra.s32 %s371_s29, 4  ;;  %s369_s28 = int_to_ptr.vmem [resolvable:$true] %s368_s28  ;;  %s593_s30 = int_to_ptr.hbm [resolvable:$true] %s592_s30 }
  0x1b   : > { %v577_v7 = vpop.eup %576  ;;  %s594_s4 = scalar_lea.hbm %s593_s30, 16  ;;  %s598_s7 = scalar_lea.hbm %s790_s3, 32 }
  0x1c   : > { %v311_v8 = vmul.f32 8.0, %v577_v7  ;;  %p595_p12 = scmp.ne.s32.totalorder %s593_s30, %s594_s4  ;;  %p599_p1 = scmp.lt.s32.totalorder %s593_s30, %s790_s3 }
  0x1d   : > { %p600_p2 = scmp.lt.s32.totalorder %s598_s7, %s594_s4 }
  0x1e   : > { %v312_v9 = vsub.f32 1.0, %v311_v8  ;;  %p596_p13 = pnand %p595_p12, %p719_p4 }
  0x1f   : > { %p601_p3 = por %p600_p2, %p599_p1 }
  0x20   : > { %v245_v2 = vld.sshfl [vmem:[#allocation1] sm:$0xff pattern:$0x75316420]  ;;  %v246_v3 = vld.sshfl [vmem:[#allocation1 + $0x8] sm:$0xff pattern:$0x75316420]  ;;  %v313_v14 = vmul.f32 %v577_v7, %v312_v9  ;;  %p597_p0 = pneg %p596_p13 }
  0x21   : > { %507 = vmatpush.msk.msra.mxu0 %vm251_vm0, %v245_v2  ;;  %509 = vmatpush.msk.msra.mxu1 %vm251_vm0, %v246_v3  ;;  %319 = vst [vmem:[#allocation1] ss:$2 sm:$0xff] %v241_v0 }
  0x22   : > { %508 = vmatmul.msk.f32.vlgmr.msra.gmra.mxu0 %vm247_vm1, %v242_v1  ;;  %510 = vmatmul.msk.f32.vlgmr.msra.gmra.mxu1 %vm247_vm1, %v242_v1  ;;  %p602_p5 = pnand %p601_p3, %p597_p0 }
  0x28   : > { %v320_v4 = vld.sshfl [vmem:[#allocation1] sm:$0xff pattern:$0x75316420]  ;;  %v321_v5 = vld.sshfl [vmem:[#allocation1 + $0x8] sm:$0xff pattern:$0x75316420] }
  0x29   : > { %324 = vst [vmem:[%s745_s10] sm:$0xf] %v320_v4 }
  0x2a   : > { %325 = vst [vmem:[%s745_s10 + $0x8] sm:$0xf] %v321_v5 }
  0x9f   : > { %v273_v10 = vpop.f32.mrf.mxu0  ;;  %v293_v11 = vpop.f32.mrf.mxu1 }
  0xa0   : > { %296 = vst [vmem:[%s215_s27] sm:$0xff] %v273_v10  ;;  %v298_v12 = vrot.slane %v273_v10, 4  ;;  %v304_v13 = vrot.slane %v293_v11, 4 }
  0xa1   : > { %297 = vst [vmem:[%s215_s27 + $0x8] sm:$0xff] %v293_v11 }
  0xa2   : > { %v299_v15 = vadd.f32 %v298_v12, %v273_v10  ;;  %v305_v16 = vadd.f32 %v304_v13, %v293_v11 }
  0xa3   : > { %605 = shalt.err (!%p602_p5)
}
  0xa4   : > { %520 = dma.vmem_to_hbm [thread:$0]  (%p719_p4), %s369_s28, 256, %s371_s29, %s349_s15   ;;  %v300_v17 = vrot.slane %v299_v15, 2  ;;  %v306_v18 = vrot.slane %v305_v16, 2  ;;  %v314_v19 = vadd.f32 %v577_v7, %v313_v14  ;;  %vm315_vm2 = vweird.f32 %v577_v7 }
  0xa5   : > { %v332_v27 = vlaneseq  ;;  %vm329_vm3 = vcmask 1040384  }
  0xa6   : > { %v301_v20 = vadd.f32 %v300_v17, %v299_v15  ;;  %v307_v21 = vadd.f32 %v306_v18, %v305_v16  ;;  %v316_v24 = vsel %vm315_vm2, %v577_v7, %v314_v19 }
  0xa7   : > { %vm334_vm4 = vcmp.lt.s32.totalorder %v332_v27, 256 }
  0xa8   : > { %v302_v22 = vrot.slane %v301_v20, 1  ;;  %v308_v23 = vrot.slane %v307_v21, 1 }
  0xaa   : > { %v303_v25 = vadd.f32 %v302_v22, %v301_v20  ;;  %v309_v26 = vadd.f32 %v308_v23, %v307_v21 }
  0xac   : > { %v318_v28 = vmul.f32 %v316_v24, %v309_v26  ;;  %v317_v29 = vmul.f32 %v316_v24, %v303_v25 }
  0xae   : > { %v328_v30 = vrot.slane %v318_v28, 7 }
  0xb0   : > { %v330_v31 = vsel %vm329_vm3, %v317_v29, %v328_v30 }
  0xb1   : > { %511 = vst.msk [vmem:[%s745_s10 + $0x4] ss:$8 sm:$0x3] %vm334_vm4, %v330_v31 }
  0xb2 PF: > { %p526_p4 = scmp.ge.s32.totalorder %s656_s17, 2  ;;  %s394_s22 = sand.u32 1, %s636_s12  }
  0xb3   : > { %s395_s11 = scalar_lea.sflag [#allocation3], %s394_s22 }
  0xb4   : > { %p523_p6 = pnand %p526_p4, %p726_p8 }
  0xb6   : > { %p524_p7 = pneg %p523_p6 }
  0xb8   : > { %631 = dma.done.wait (%p524_p7), %s395_s11, 256  }
  0xb9   : > { %633 = vsyncadd (%p524_p7), %s395_s11, 4294967040  ;;  %s17_s17 = sadd.s32 1, %s656_s17   ;;  %s793_s12 = smov %s640_s13 }
  0xba   : > { %p14_p9 = scmp.ge.s32.totalorder %s17_s17, 4   ;;  %s794_s13 = smov %s644_s14 }
  0xbb   : > { %s795_s14 = smov %s732_s25  ;;  %s796_s15 = smov %s652_s16 }
  0xbc   : > { %s797_s16 = smov %s799_s20  ;;  %16 = sbr.rel (!%p14_p9) target bundleno = 4 (0x4), region = 79 }
  0xc1   :  { %401 = vsyncpa [#allocation3], 1 }
  0xc2   :  { %403 = vsyncpa [#allocation3 + $0x1], 1 }

</bundles_post_ra>
